<compile_context>
chip_gen: v7x
topology: tpu7x:2x2x1
jax: 0.10.0
libtpu: 0.0.40
codegen_flags: <defaults>
</compile_context>

<pallas_src>
import math

import jax
import jax.numpy as jnp
from jax.experimental import pallas as pl
from jax.experimental.pallas import tpu as pltpu

# ----------------------------- problem sizes -------------------------------
B, T = 2, 32                      # batch, time
R_DIM, G_DIM, S_DIM = 16, 16, 32  # residual_dim, gate_dim, skip_dim
KSIZE, DIL = 3, 1                 # kernel_size, dilation
N_LANES = B * T                   # flattened (batch*time) lanes
BN_EPS = 1e-5
SQRT_HALF = math.sqrt(0.5)

# advisory cost estimate (lets XLA overlap this tiny, dispatch-bound call)
_COST_FLOPS = (2 * (2 * G_DIM) * (KSIZE * R_DIM) * N_LANES
               + 2 * (R_DIM + S_DIM) * (KSIZE * G_DIM) * N_LANES)
_COST_TRANS = 2 * G_DIM * N_LANES + 2 * (2 * G_DIM + R_DIM + S_DIM)
_COST_BYTES = 4 * (2 * B * R_DIM * T + B * S_DIM * T
                   + (2 * G_DIM) * (KSIZE * R_DIM + 2)
                   + (R_DIM + S_DIM) * (KSIZE * G_DIM + 2))


# ------------------------------ Pallas kernel ------------------------------
def wn_cell_kernel(x_ref,                 # (B, R, T)          native NCT input
                   w_in_ref, bn_in_ref,   # (2G, K*R), (2G, 2)
                   w_sr_ref, bn_sr_ref,   # (R+S, K*G), (R+S, 2)
                   res_ref, skip_ref):    # (B, R, T), (B, S, T)  native outputs
    f32 = jnp.float32

    # channels-on-sublanes / (B*T)-on-lanes working layout: (C, N_LANES)
    x = jnp.concatenate([x_ref[b] for b in range(B)], axis=1)      # (R, 64)

    # per-column time index -> masks for the 'same' conv boundaries.  Since
    # lane n = b*T + t, batch boundaries coincide with t==0 / t==T-1, so the
    # masks also prevent the rolls from leaking across batches.
    t_idx = jax.lax.broadcasted_iota(jnp.int32, (1, N_LANES), 1) % T
    is_first = t_idx == 0
    is_last = t_idx == (T - 1)

    def taps(v):
        """im2col: stack [v(t-1); v(t); v(t+1)] along sublanes (contraction dim).

        Sublane concat at multiples of 8 is just vreg placement; the lane-axis
        rolls are XLU work, and the wrapped columns are exactly the masked
        boundary columns."""
        vm1 = jnp.where(is_first, 0.0, pltpu.roll(v, shift=1, axis=1))
        vp1 = jnp.where(is_last, 0.0, pltpu.roll(v, shift=N_LANES - 1, axis=1))
        return jnp.concatenate([vm1, v, vp1], axis=0)               # (3C, 64)

    def conv_bn(v, w_ref, bn_ref):
        """k=3 'same' Conv1d (one MXU dot) + training-mode BatchNorm1d.

        Conv bias intentionally omitted: it only shifts the per-channel mean,
        so it cancels exactly under training-mode BN.  bn_ref columns are
        [gamma, beta] per channel (sqrt(0.5) pre-folded for the res rows)."""
        y = jnp.dot(w_ref[...], taps(v), preferred_element_type=f32)
        mean = jnp.mean(y, axis=1, keepdims=True)
        var = jnp.mean(jnp.square(y - mean), axis=1, keepdims=True)
        return ((y - mean) * jax.lax.rsqrt(var + BN_EPS)
                * bn_ref[:, 0:1] + bn_ref[:, 1:2])

    # ---- in_layer: one (2G, K*R) @ (K*R, N) dot + BN + gated activation ----
    acts = conv_bn(x, w_in_ref, bn_in_ref)                           # (2G, 64)
    a = jnp.tanh(acts[:G_DIM, :]) * jax.nn.sigmoid(acts[G_DIM:, :])  # (G, 64)

    # ---- res + skip fused: one (R+S, K*G) @ (K*G, N) dot + BN -------------
    y = conv_bn(a, w_sr_ref, bn_sr_ref)              # rows: [res (R) ; skip (S)]

    # residual add; the sqrt(0.5) on the BN branch is already folded into the
    # res rows of bn_sr, so only x needs the scale here.
    res = x * SQRT_HALF + y[:R_DIM, :]                               # (R, 64)
    skip = y[R_DIM:, :]                                              # (S, 64)

    # split the packed lanes back into the two native (B, C, T) outputs
    for b in range(B):
        res_ref[b] = res[:, b * T:(b + 1) * T]
        skip_ref[b] = skip[:, b * T:(b + 1) * T]


# ------------------------------ JAX wrapper --------------------------------
def wn_cell(x_nct, params):
    """x_nct: (B, residual_dim, T) float32, PyTorch NCT layout.

    Returns (res (B, R, T), skip (B, S, T)) straight out of the kernel --
    no wrapper-side transposes / reshapes / concats (all weight fusion is done
    once at init time in init_params)."""
    vmem = pl.BlockSpec(memory_space=pltpu.MemorySpace.VMEM)
    return pl.pallas_call(
        wn_cell_kernel,
        out_shape=(jax.ShapeDtypeStruct((B, R_DIM, T), jnp.float32),
                   jax.ShapeDtypeStruct((B, S_DIM, T), jnp.float32)),
        in_specs=[vmem] * 5,
        out_specs=(vmem, vmem),
        cost_estimate=pl.CostEstimate(flops=_COST_FLOPS,
                                      transcendentals=_COST_TRANS,
                                      bytes_accessed=_COST_BYTES),
    )(x_nct, params["w_in"], params["bn_in"], params["w_sr"], params["bn_sr"])


# --------------------------- parameter creation ----------------------------
def init_params(key):
    """All weight fusion happens here (init time), not per forward call.

    Conv weights are stored in the fused im2col layout (C_out, K*C_in) with
    taps ordered [t-1, t, t+1]; importing real PyTorch Conv1d weights
    ((C_out, C_in, K), cross-correlation) requires the same (0,2,1) transpose
    + reshape used below."""
    ks = jax.random.split(key, 3)

    def conv_w(k, c_out, c_in):
        # torch.nn.init.xavier_uniform_, gain('linear')=1,
        # fan_in = c_in*K, fan_out = c_out*K
        bound = math.sqrt(6.0 / (c_in * KSIZE + c_out * KSIZE))
        w = jax.random.uniform(k, (c_out, c_in, KSIZE), jnp.float32, -bound, bound)
        return jnp.transpose(w, (0, 2, 1)).reshape(c_out, KSIZE * c_in)

    def bn_affine(c, scale=1.0):
        # columns: [gamma (init 1, optionally pre-scaled), beta (init 0)].
        # Conv biases are not generated: exact no-ops under training-mode BN.
        return jnp.concatenate([jnp.full((c, 1), scale, jnp.float32),
                                jnp.zeros((c, 1), jnp.float32)], axis=1)

    w_in = conv_w(ks[0], 2 * G_DIM, R_DIM)           # (2G, K*R)
    w_res = conv_w(ks[1], R_DIM, G_DIM)              # (R,  K*G)
    w_skip = conv_w(ks[2], S_DIM, G_DIM)             # (S,  K*G)

    # fuse res|skip output channels into one weight / one BN pass; fold the
    # sqrt(0.5) residual scale into the res rows of the BN affine (exact).
    w_sr = jnp.concatenate([w_res, w_skip], axis=0)                  # (R+S, K*G)
    bn_sr = jnp.concatenate([bn_affine(R_DIM, SQRT_HALF),
                             bn_affine(S_DIM)], axis=0)              # (R+S, 2)

    return dict(w_in=w_in, bn_in=bn_affine(2 * G_DIM), w_sr=w_sr, bn_sr=bn_sr)


# --------------------------- pure-JAX reference ----------------------------
def _ref_conv_same(x_nct, w_fused):
    """'same' k=3 cross-correlation (PyTorch Conv1d, no bias) using the fused
    (C_out, K*C_in) weight; taps ordered [t-1, t, t+1]."""
    xp = jnp.pad(x_nct, ((0, 0), (0, 0), (1, 1)))
    cols = jnp.concatenate([xp[:, :, 0:T], xp[:, :, 1:T + 1], xp[:, :, 2:T + 2]],
                           axis=1)                                   # (B, K*Cin, T)
    return jnp.einsum("ok,bkt->bot", w_fused, cols,
                      precision=jax.lax.Precision.HIGHEST)


def _ref_bn_train(y):
    mean = jnp.mean(y, axis=(0, 2), keepdims=True)
    var = jnp.mean(jnp.square(y - mean), axis=(0, 2), keepdims=True)
    return (y - mean) / jnp.sqrt(var + BN_EPS)       # gamma=1, beta=0 at init


def wn_cell_ref(x, params):
    """Original (unfolded) module math at init: validates the kernel's fusions."""
    acts = _ref_bn_train(_ref_conv_same(x, params["w_in"]))
    a = jnp.tanh(acts[:, :G_DIM]) * jax.nn.sigmoid(acts[:, G_DIM:])
    y = _ref_bn_train(_ref_conv_same(a, params["w_sr"]))
    return (x + y[:, :R_DIM]) * SQRT_HALF, y[:, R_DIM:]


# ---------------------------------- main -----------------------------------
if __name__ == "__main__":
    key = jax.random.PRNGKey(0)
    k_x, k_p = jax.random.split(key)
    x = jax.random.normal(k_x, (B, R_DIM, T), jnp.float32)   # PyTorch NCT layout
    params = init_params(k_p)

    res, skip = jax.jit(wn_cell)(x, params)
    jax.block_until_ready((res, skip))

    assert res.shape == (B, R_DIM, T) and res.dtype == jnp.float32
    assert skip.shape == (B, S_DIM, T) and skip.dtype == jnp.float32

    res_want, skip_want = wn_cell_ref(x, params)
    assert bool(jnp.allclose(res, res_want, atol=2e-3, rtol=2e-3))
    assert bool(jnp.allclose(skip, skip_want, atol=2e-3, rtol=2e-3))

    print("KERNEL_OK")
</pallas_src>

<mosaic_0001>
module attributes {stable_mosaic.version = 11 : i64} {
  func.func @wn_cell_kernel(%arg0: memref<2x16x32xf32, #tpu.memory_space<vmem>>, %arg1: memref<32x48xf32, #tpu.memory_space<vmem>>, %arg2: memref<32x2xf32, #tpu.memory_space<vmem>>, %arg3: memref<48x48xf32, #tpu.memory_space<vmem>>, %arg4: memref<48x2xf32, #tpu.memory_space<vmem>>, %arg5: memref<2x16x32xf32, #tpu.memory_space<vmem>>, %arg6: memref<2x32x32xf32, #tpu.memory_space<vmem>>) attributes {dimension_semantics = [], scalar_prefetch = 0 : i64, scratch_operands = 0 : i64, tpu.core_type = #tpu.core_type<tc>} {
    %c0 = arith.constant 0 : index
    %c0_0 = arith.constant 0 : index
    %c0_1 = arith.constant 0 : index
    %0 = vector.load %arg0[%c0, %c0_0, %c0_1] : memref<2x16x32xf32, #tpu.memory_space<vmem>>, vector<1x16x32xf32>
    %1 = vector.shape_cast %0 : vector<1x16x32xf32> to vector<16x32xf32>
    %c1 = arith.constant 1 : index
    %c0_2 = arith.constant 0 : index
    %c0_3 = arith.constant 0 : index
    %2 = vector.load %arg0[%c1, %c0_2, %c0_3] : memref<2x16x32xf32, #tpu.memory_space<vmem>>, vector<1x16x32xf32>
    %3 = vector.shape_cast %2 : vector<1x16x32xf32> to vector<16x32xf32>
    %4 = tpu.concatenate %1, %3 in 1 : vector<16x32xf32>, vector<16x32xf32> -> vector<16x64xf32>
    %5 = tpu.iota {dimensions = array<i32: 1>} : vector<1x64xi32>
    %c32_i32 = arith.constant 32 : i32
    %c0_i32 = arith.constant 0 : i32
    %6 = arith.cmpi eq, %c32_i32, %c0_i32 : i32
    %c1_i32 = arith.constant 1 : i32
    %7 = arith.select %6, %c1_i32, %c32_i32 : i32
    %8 = vector.broadcast %7 : i32 to vector<1x64xi32>
    %9 = arith.remsi %5, %8 : vector<1x64xi32>
    %c0_i32_4 = arith.constant 0 : i32
    %10 = vector.broadcast %c0_i32_4 : i32 to vector<1x64xi32>
    %11 = arith.cmpi ne, %9, %10 : vector<1x64xi32>
    %c0_i32_5 = arith.constant 0 : i32
    %12 = vector.broadcast %c0_i32_5 : i32 to vector<1x64xi32>
    %13 = arith.cmpi slt, %9, %12 : vector<1x64xi32>
    %c0_i32_6 = arith.constant 0 : i32
    %14 = arith.cmpi slt, %7, %c0_i32_6 : i32
    %15 = vector.broadcast %14 : i1 to vector<1x64xi1>
    %16 = vector.broadcast %15 : vector<1x64xi1> to vector<1x64xi1>
    %17 = arith.xori %13, %16 : vector<1x64xi1>
    %18 = arith.andi %17, %11 : vector<1x64xi1>
    %19 = vector.broadcast %7 : i32 to vector<1x64xi32>
    %20 = arith.addi %9, %19 : vector<1x64xi32>
    %21 = arith.select %18, %20, %9 : vector<1x64xi1>, vector<1x64xi32>
    %c0_i32_7 = arith.constant 0 : i32
    %22 = vector.broadcast %c0_i32_7 : i32 to vector<1x64xi32>
    %23 = arith.cmpi eq, %21, %22 : vector<1x64xi32>
    %c31_i32 = arith.constant 31 : i32
    %24 = vector.broadcast %c31_i32 : i32 to vector<1x64xi32>
    %25 = arith.cmpi eq, %21, %24 : vector<1x64xi32>
    %c0_8 = arith.constant 0 : index
    %c0_9 = arith.constant 0 : index
    %26 = vector.load %arg1[%c0_8, %c0_9] : memref<32x48xf32, #tpu.memory_space<vmem>>, vector<32x48xf32>
    %c1_i32_10 = arith.constant 1 : i32
    %27 = tpu.dynamic_rotate %4 by %c1_i32_10 dim 1 : vector<16x64xf32>, i32 -> vector<16x64xf32>
    %cst = arith.constant 0.000000e+00 : f32
    %28 = vector.shape_cast %23 : vector<1x64xi1> to vector<1x64xi1>
    %29 = vector.broadcast %28 : vector<1x64xi1> to vector<16x64xi1>
    %30 = vector.broadcast %cst : f32 to vector<16x64xf32>
    %31 = arith.select %29, %30, %27 : vector<16x64xi1>, vector<16x64xf32>
    %c63_i32 = arith.constant 63 : i32
    %32 = tpu.dynamic_rotate %4 by %c63_i32 dim 1 : vector<16x64xf32>, i32 -> vector<16x64xf32>
    %cst_11 = arith.constant 0.000000e+00 : f32
    %33 = vector.shape_cast %25 : vector<1x64xi1> to vector<1x64xi1>
    %34 = vector.broadcast %33 : vector<1x64xi1> to vector<16x64xi1>
    %35 = vector.broadcast %cst_11 : f32 to vector<16x64xf32>
    %36 = arith.select %34, %35, %32 : vector<16x64xi1>, vector<16x64xf32>
    %37 = tpu.concatenate %31, %4, %36 in 0 : vector<16x64xf32>, vector<16x64xf32>, vector<16x64xf32> -> vector<48x64xf32>
    %cst_12 = arith.constant dense<0.000000e+00> : vector<32x64xf32>
    %38 = tpu.matmul %26, %37, %cst_12 {dimension_numbers = #tpu.dot_dimension_numbers<[1], [0], [0], [1], [0, 0, 1, 1], [], []>} : vector<32x48xf32>, vector<48x64xf32>, vector<32x64xf32> -> vector<32x64xf32>
    %cst_13 = arith.constant dense<0.000000e+00> : vector<32xf32>
    %39 = vector.multi_reduction <add>, %38, %cst_13 [1] : vector<32x64xf32> to vector<32xf32>
    %40 = vector.shape_cast %39 : vector<32xf32> to vector<32x1xf32>
    %cst_14 = arith.constant 6.400000e+01 : f32
    %41 = vector.broadcast %cst_14 : f32 to vector<32x1xf32>
    %42 = arith.divf %40, %41 : vector<32x1xf32>
    %43 = vector.broadcast %42 : vector<32x1xf32> to vector<32x64xf32>
    %44 = arith.subf %38, %43 : vector<32x64xf32>
    %45 = arith.mulf %44, %44 : vector<32x64xf32>
    %cst_15 = arith.constant dense<0.000000e+00> : vector<32xf32>
    %46 = vector.multi_reduction <add>, %45, %cst_15 [1] : vector<32x64xf32> to vector<32xf32>
    %47 = vector.shape_cast %46 : vector<32xf32> to vector<32x1xf32>
    %cst_16 = arith.constant 6.400000e+01 : f32
    %48 = vector.broadcast %cst_16 : f32 to vector<32x1xf32>
    %49 = arith.divf %47, %48 : vector<32x1xf32>
    %50 = vector.broadcast %42 : vector<32x1xf32> to vector<32x64xf32>
    %51 = arith.subf %38, %50 : vector<32x64xf32>
    %cst_17 = arith.constant 9.99999974E-6 : f32
    %52 = vector.broadcast %cst_17 : f32 to vector<32x1xf32>
    %53 = arith.addf %49, %52 : vector<32x1xf32>
    %54 = math.rsqrt %53 : vector<32x1xf32>
    %55 = vector.broadcast %54 : vector<32x1xf32> to vector<32x64xf32>
    %56 = arith.mulf %51, %55 : vector<32x64xf32>
    %c0_18 = arith.constant 0 : index
    %c0_19 = arith.constant 0 : index
    %57 = vector.load %arg2[%c0_18, %c0_19] : memref<32x2xf32, #tpu.memory_space<vmem>>, vector<32x1xf32>
    %58 = vector.broadcast %57 : vector<32x1xf32> to vector<32x64xf32>
    %59 = arith.mulf %56, %58 : vector<32x64xf32>
    %c0_20 = arith.constant 0 : index
    %c1_21 = arith.constant 1 : index
    %60 = vector.load %arg2[%c0_20, %c1_21] : memref<32x2xf32, #tpu.memory_space<vmem>>, vector<32x1xf32>
    %61 = vector.broadcast %60 : vector<32x1xf32> to vector<32x64xf32>
    %62 = arith.addf %59, %61 : vector<32x64xf32>
    %63 = vector.extract_strided_slice %62 {offsets = [0, 0], sizes = [16, 64], strides = [1, 1]} : vector<32x64xf32> to vector<16x64xf32>
    %64 = math.tanh %63 : vector<16x64xf32>
    %65 = vector.extract_strided_slice %62 {offsets = [16, 0], sizes = [16, 64], strides = [1, 1]} : vector<32x64xf32> to vector<16x64xf32>
    %66 = arith.negf %65 : vector<16x64xf32>
    %67 = math.exp %66 : vector<16x64xf32>
    %cst_22 = arith.constant 1.000000e+00 : f32
    %68 = vector.broadcast %cst_22 : f32 to vector<16x64xf32>
    %69 = arith.addf %68, %67 : vector<16x64xf32>
    %70 = arith.divf %68, %69 : vector<16x64xf32>
    %71 = arith.mulf %64, %70 : vector<16x64xf32>
    %c0_23 = arith.constant 0 : index
    %c0_24 = arith.constant 0 : index
    %72 = vector.load %arg3[%c0_23, %c0_24] : memref<48x48xf32, #tpu.memory_space<vmem>>, vector<48x48xf32>
    %c1_i32_25 = arith.constant 1 : i32
    %73 = tpu.dynamic_rotate %71 by %c1_i32_25 dim 1 : vector<16x64xf32>, i32 -> vector<16x64xf32>
    %cst_26 = arith.constant 0.000000e+00 : f32
    %74 = vector.shape_cast %23 : vector<1x64xi1> to vector<1x64xi1>
    %75 = vector.broadcast %74 : vector<1x64xi1> to vector<16x64xi1>
    %76 = vector.broadcast %cst_26 : f32 to vector<16x64xf32>
    %77 = arith.select %75, %76, %73 : vector<16x64xi1>, vector<16x64xf32>
    %c63_i32_27 = arith.constant 63 : i32
    %78 = tpu.dynamic_rotate %71 by %c63_i32_27 dim 1 : vector<16x64xf32>, i32 -> vector<16x64xf32>
    %cst_28 = arith.constant 0.000000e+00 : f32
    %79 = vector.shape_cast %25 : vector<1x64xi1> to vector<1x64xi1>
    %80 = vector.broadcast %79 : vector<1x64xi1> to vector<16x64xi1>
    %81 = vector.broadcast %cst_28 : f32 to vector<16x64xf32>
    %82 = arith.select %80, %81, %78 : vector<16x64xi1>, vector<16x64xf32>
    %83 = tpu.concatenate %77, %71, %82 in 0 : vector<16x64xf32>, vector<16x64xf32>, vector<16x64xf32> -> vector<48x64xf32>
    %cst_29 = arith.constant dense<0.000000e+00> : vector<48x64xf32>
    %84 = tpu.matmul %72, %83, %cst_29 {dimension_numbers = #tpu.dot_dimension_numbers<[1], [0], [0], [1], [0, 0, 1, 1], [], []>} : vector<48x48xf32>, vector<48x64xf32>, vector<48x64xf32> -> vector<48x64xf32>
    %cst_30 = arith.constant dense<0.000000e+00> : vector<48xf32>
    %85 = vector.multi_reduction <add>, %84, %cst_30 [1] : vector<48x64xf32> to vector<48xf32>
    %86 = vector.shape_cast %85 : vector<48xf32> to vector<48x1xf32>
    %cst_31 = arith.constant 6.400000e+01 : f32
    %87 = vector.broadcast %cst_31 : f32 to vector<48x1xf32>
    %88 = arith.divf %86, %87 : vector<48x1xf32>
    %89 = vector.broadcast %88 : vector<48x1xf32> to vector<48x64xf32>
    %90 = arith.subf %84, %89 : vector<48x64xf32>
    %91 = arith.mulf %90, %90 : vector<48x64xf32>
    %cst_32 = arith.constant dense<0.000000e+00> : vector<48xf32>
    %92 = vector.multi_reduction <add>, %91, %cst_32 [1] : vector<48x64xf32> to vector<48xf32>
    %93 = vector.shape_cast %92 : vector<48xf32> to vector<48x1xf32>
    %cst_33 = arith.constant 6.400000e+01 : f32
    %94 = vector.broadcast %cst_33 : f32 to vector<48x1xf32>
    %95 = arith.divf %93, %94 : vector<48x1xf32>
    %96 = vector.broadcast %88 : vector<48x1xf32> to vector<48x64xf32>
    %97 = arith.subf %84, %96 : vector<48x64xf32>
    %cst_34 = arith.constant 9.99999974E-6 : f32
    %98 = vector.broadcast %cst_34 : f32 to vector<48x1xf32>
    %99 = arith.addf %95, %98 : vector<48x1xf32>
    %100 = math.rsqrt %99 : vector<48x1xf32>
    %101 = vector.broadcast %100 : vector<48x1xf32> to vector<48x64xf32>
    %102 = arith.mulf %97, %101 : vector<48x64xf32>
    %c0_35 = arith.constant 0 : index
    %c0_36 = arith.constant 0 : index
    %103 = vector.load %arg4[%c0_35, %c0_36] : memref<48x2xf32, #tpu.memory_space<vmem>>, vector<48x1xf32>
    %104 = vector.broadcast %103 : vector<48x1xf32> to vector<48x64xf32>
    %105 = arith.mulf %102, %104 : vector<48x64xf32>
    %c0_37 = arith.constant 0 : index
    %c1_38 = arith.constant 1 : index
    %106 = vector.load %arg4[%c0_37, %c1_38] : memref<48x2xf32, #tpu.memory_space<vmem>>, vector<48x1xf32>
    %107 = vector.broadcast %106 : vector<48x1xf32> to vector<48x64xf32>
    %108 = arith.addf %105, %107 : vector<48x64xf32>
    %cst_39 = arith.constant 0.707106769 : f32
    %109 = vector.broadcast %cst_39 : f32 to vector<16x64xf32>
    %110 = arith.mulf %4, %109 : vector<16x64xf32>
    %111 = vector.extract_strided_slice %108 {offsets = [0, 0], sizes = [16, 64], strides = [1, 1]} : vector<48x64xf32> to vector<16x64xf32>
    %112 = arith.addf %110, %111 : vector<16x64xf32>
    %113 = vector.extract_strided_slice %108 {offsets = [16, 0], sizes = [32, 64], strides = [1, 1]} : vector<48x64xf32> to vector<32x64xf32>
    %114 = vector.extract_strided_slice %112 {offsets = [0, 0], sizes = [16, 32], strides = [1, 1]} : vector<16x64xf32> to vector<16x32xf32>
    %c0_40 = arith.constant 0 : index
    %c0_41 = arith.constant 0 : index
    %c0_42 = arith.constant 0 : index
    %115 = vector.load %arg5[%c0_40, %c0_41, %c0_42] : memref<2x16x32xf32, #tpu.memory_space<vmem>>, vector<1x16x32xf32>
    %116 = vector.shape_cast %115 : vector<1x16x32xf32> to vector<16x32xf32>
    %117 = vector.shape_cast %114 : vector<16x32xf32> to vector<1x16x32xf32>
    tpu.vector_store %arg5[%c0_40, %c0_41, %c0_42], %117 {strides = array<i32>} : memref<2x16x32xf32, #tpu.memory_space<vmem>>, vector<1x16x32xf32>,
    %118 = vector.extract_strided_slice %113 {offsets = [0, 0], sizes = [32, 32], strides = [1, 1]} : vector<32x64xf32> to vector<32x32xf32>
    %c0_43 = arith.constant 0 : index
    %c0_44 = arith.constant 0 : index
    %c0_45 = arith.constant 0 : index
    %119 = vector.load %arg6[%c0_43, %c0_44, %c0_45] : memref<2x32x32xf32, #tpu.memory_space<vmem>>, vector<1x32x32xf32>
    %120 = vector.shape_cast %119 : vector<1x32x32xf32> to vector<32x32xf32>
    %121 = vector.shape_cast %118 : vector<32x32xf32> to vector<1x32x32xf32>
    tpu.vector_store %arg6[%c0_43, %c0_44, %c0_45], %121 {strides = array<i32>} : memref<2x32x32xf32, #tpu.memory_space<vmem>>, vector<1x32x32xf32>,
    %122 = vector.extract_strided_slice %112 {offsets = [0, 32], sizes = [16, 32], strides = [1, 1]} : vector<16x64xf32> to vector<16x32xf32>
    %c1_46 = arith.constant 1 : index
    %c0_47 = arith.constant 0 : index
    %c0_48 = arith.constant 0 : index
    %123 = vector.load %arg5[%c1_46, %c0_47, %c0_48] : memref<2x16x32xf32, #tpu.memory_space<vmem>>, vector<1x16x32xf32>
    %124 = vector.shape_cast %123 : vector<1x16x32xf32> to vector<16x32xf32>
    %125 = vector.shape_cast %122 : vector<16x32xf32> to vector<1x16x32xf32>
    tpu.vector_store %arg5[%c1_46, %c0_47, %c0_48], %125 {strides = array<i32>} : memref<2x16x32xf32, #tpu.memory_space<vmem>>, vector<1x16x32xf32>,
    %126 = vector.extract_strided_slice %113 {offsets = [0, 32], sizes = [32, 32], strides = [1, 1]} : vector<32x64xf32> to vector<32x32xf32>
    %c1_49 = arith.constant 1 : index
    %c0_50 = arith.constant 0 : index
    %c0_51 = arith.constant 0 : index
    %127 = vector.load %arg6[%c1_49, %c0_50, %c0_51] : memref<2x32x32xf32, #tpu.memory_space<vmem>>, vector<1x32x32xf32>
    %128 = vector.shape_cast %127 : vector<1x32x32xf32> to vector<32x32xf32>
    %129 = vector.shape_cast %126 : vector<32x32xf32> to vector<1x32x32xf32>
    tpu.vector_store %arg6[%c1_49, %c0_50, %c0_51], %129 {strides = array<i32>} : memref<2x32x32xf32, #tpu.memory_space<vmem>>, vector<1x32x32xf32>,
    return
  }
}

</mosaic_0001>

<bundles_post_ra>
// kernel: wn_cell.1
= control target key start
LH: loop header
LB: loop body
LE: loop exit
PB: predicated region body
PF: predicated region fallthrough
CT: control target
= control target key end

     0   :  { %12 = vsyncpa [#allocation3], 0  ;;  %s1288_s0 = inlined_call_operand.vmem [shape: f32[2,16,32], index: 0, kind: input, shape index: {}]   ;;  %s1289_s1 = inlined_call_operand.hbm [shape: f32[32,48], index: 1, kind: input, shape index: {}]   ;;  %s1290_s2 = inlined_call_operand.vmem [shape: f32[32,2], index: 2, kind: input, shape index: {}]   ;;  %s1291_s3 = inlined_call_operand.vmem [shape: f32[48,48], index: 3, kind: input, shape index: {}]   ;;  %s1292_s4 = inlined_call_operand.vmem [shape: f32[48,2], index: 4, kind: input, shape index: {}]   ;;  %s1293_s5 = inlined_call_operand.hbm [shape: f32[2,16,32], index: 5, kind: output, shape index: {0}]   ;;  %s1294_s6 = inlined_call_operand.hbm [shape: f32[2,32,32], index: 6, kind: output, shape index: {1}]  }
   0x1   :  { %13 = vsyncpa [#allocation4], 0 }
   0x2   :  { %14 = vsyncpa [#allocation7], 0  ;;  %s988_s21 = smov [#allocation2]   ;;  %s916_s25 = scalar_lea.hbm %s1289_s1, 512 }
   0x3   :  { %s22_s22 = sshll.u32 %s988_s21, 4  ;;  %p917_p0 = scmp.ne.s32.totalorder %s1289_s1, %s916_s25  ;;  %s23_s22 = int_to_ptr.vmem [resolvable:$true] %s22_s22 }
   0x4   :  { %p920_p1 = scmp.lt.u32.totalorder %s916_s25, %s1289_s1 }
   0x6   :  { %p922_p2 = pnand %p920_p1, %p917_p0 }
   0x8   :  { %925 = shalt.err (!%p922_p2)
}
   0x9   :  { %s926_s30 = scalar_lea.vmem %s23_s22, 512  ;;  %p931_p4 = scmp.lt.s32.totalorder %s23_s22, %s23_s22 }
   0xa   :  { %p927_p3 = scmp.ne.s32.totalorder %s23_s22, %s926_s30  ;;  %p932_p5 = scmp.lt.s32.totalorder %s926_s30, %s926_s30 }
   0xc   :  { %p933_p6 = por %p932_p5, %p931_p4 }
   0xe   :  { %p934_p7 = pnand %p933_p6, %p927_p3 }
  0x10   :  { %937 = shalt.err (!%p934_p7)
}
  0x11   :  { %s989_s7 = smov 128   ;;  %s990_s8 = smov 8  }
  0x12   :  { %28 = dma.hbm_to_vmem [thread:$0]  %s1289_s1, 512, %s23_s22, [#allocation3], %s989_s7, %s989_s7, %s990_s8  }
  0x13   :  { %982 = dma.done.wait [#allocation3], 512  }
  0x14   :  { %983 = vsyncadd [#allocation3], 4294966784  ;;  %v699_v0 = vld [vmem:[%s1288_s0 + $0x10] sm:$0xff]  ;;  %s991_s13 = smov 32   ;;  %v700_v1 = vld [vmem:[%s1288_s0 + $0x18] sm:$0xff]  ;;  %vm51_vm0 = vcmask 261120   ;;  %v54_v22 = vlaneseq }
  0x15   :  { %45 = vrot.lane.b32.xlu0 %v699_v0, %s991_s13  ;;  %v38_v3 = vld [vmem:[%s1288_s0] sm:$0xff]  ;;  %v39_v4 = vld [vmem:[%s1288_s0 + $0x8] sm:$0xff]  ;;  %s992_s19 = smov 64   ;;  %vm74_vm1 = vcmask 1048064   ;;  %s993_s0 = smov 127   ;;  %vm109_vm2 = vcmask 392192  }
  0x16   :  { %s994_s20 = smov 65   ;;  %v70_v21 = vld [vmem:[#allocation2] sm:$0xff]  ;;  %v55_v23 = vand.u32 127, %v54_v22  ;;  %v71_v36 = vld [vmem:[#allocation2 + $0x8] sm:$0xff]  ;;  %v72_v37 = vld [vmem:[#allocation2 + $0x10] sm:$0xff]  ;;  %v995_v39 = vmov 0  }
  0x17   :  { %765 = vmatprep.mubr.msk.f32.mxu0 %vm109_vm2, %v70_v21  ;;  %v73_v38 = vld [vmem:[#allocation2 + $0x18] sm:$0xff]  ;;  %856 = vset.pattern.permute.xlu1 %v995_v39  ;;  %vm207_vm7 = vcmask 523264   ;;  %v263_v48 = vld [vmem:[%s1290_s2 + $0x10] sm:$0xff]  ;;  %v996_v49 = vmov 1   ;;  %v329_v34 = vld [vmem:[%s1291_s3 + $0x20] sm:$0xff]  ;;  %s998_s27 = smov [#allocation5]  }
  0x18   :  { %v60_v24 = vand.u32 31, %v55_v23  ;;  %857 = vset.pattern.permute.xlu0 %v995_v39  ;;  %v328_v29 = vld [vmem:[%s1291_s3 + $0x18] sm:$0xff]  ;;  %s671_s28 = sshll.u32 %s998_s27, 4  ;;  %s672_s28 = int_to_ptr.vmem [resolvable:$true] %s671_s28 }
  0x19   :  { %47 = vrot.lane.b32.xlu0 %v700_v1, %s991_s13  ;;  %p943_p9 = scmp.lt.s32.totalorder %s672_s28, %s672_s28 }
  0x1a   :  { %vm729_vm3 = vcmp.ne.s32.totalorder %v60_v24, 0  ;;  %vm730_vm5 = vcmp.ne.s32.totalorder %v60_v24, 31 }
  0x1b   :  { %vm1083_vm4 = vmpackc.low %vm729_vm3, %vm729_vm3 }
  0x1c   :  { %vm1093_vm6 = vmpackc.low %vm730_vm5, %vm730_vm5 }
  0x87   :  { %v46_v2 = vpop.permute.xlu0 %45 }
  0x88   :  { %v1063_v6 = vsel %vm51_vm0, %v38_v3, %v46_v2 }
  0x8b   :  { %v48_v5 = vpop.permute.xlu0 %47 }
  0x8c   :  { %v1066_v7 = vsel %vm51_vm0, %v39_v4, %v48_v5  ;;  %v264_v4 = vld [vmem:[%s1290_s2 + $0x18] sm:$0xff]  ;;  %v261_v5 = vld [vmem:[%s1290_s2] sm:$0xff] }
  0x8d   :  { %v836_v8 = vpack.i.bf16 %v1066_v7, %v1063_v6  ;;  %v798_v33 = vpack.c.bf16 %v1066_v7, %v1063_v6 }
  0x8f   :  { %837 = vrot.lane.b32.xlu1 %v836_v8, %s992_s19 }
 0x101   :  { %v838_v9 = vpop.permute.xlu1 %837 }
 0x102   :  { %v840_v10 = vunpack.i.h.bf16 %v838_v9  ;;  %v839_v11 = vunpack.i.l.bf16 %v838_v9 }
 0x104   :  { %v77_v12 = vsel %vm74_vm1, %v839_v11, %v1063_v6  ;;  %v80_v13 = vsel %vm74_vm1, %v840_v10, %v1066_v7  ;;  %v262_v10 = vld [vmem:[%s1290_s2 + $0x8] sm:$0xff]  ;;  %s938_s2 = scalar_lea.vmem %s672_s28, 512 }
 0x105   :  { %v841_v14 = vpack.i.bf16 %v80_v13, %v77_v12  ;;  %p939_p8 = scmp.ne.s32.totalorder %s672_s28, %s938_s2  ;;  %p944_p10 = scmp.lt.s32.totalorder %s938_s2, %s938_s2 }
 0x107   :  { %842 = vrot.lane.b32.xlu1 %v841_v14, %s992_s19  ;;  %p945_p11 = por %p944_p10, %p943_p9 }
 0x109   :  { %p946_p12 = pnand %p945_p11, %p939_p8 }
 0x179   :  { %v843_v15 = vpop.permute.xlu1 %842 }
 0x17a   :  { %v845_v16 = vunpack.i.h.bf16 %v843_v15  ;;  %v844_v17 = vunpack.i.l.bf16 %v843_v15 }
 0x17c   :  { %v85_v18 = vsel %vm74_vm1, %v844_v17, %v1063_v6  ;;  %v86_v19 = vsel %vm74_vm1, %v845_v16, %v1066_v7 }
 0x17d   :  { %v851_v20 = vpack.i.bf16 %v86_v19, %v85_v18 }
 0x17f   :  { %852 = vrot.lane.b32.xlu1 %v851_v20, %s993_s0  ;;  %847 = vrot.lane.b32.xlu0 %v851_v20, %s994_s20 }
 0x1f1   :  { %v848_v25 = vpop.permute.xlu0 %847  ;;  %v853_v28 = vpop.permute.xlu1 %852 }
 0x1f2   :  { %v850_v26 = vunpack.i.h.bf16 %v848_v25  ;;  %v849_v27 = vunpack.i.l.bf16 %v848_v25  ;;  %v855_v31 = vunpack.i.h.bf16 %v853_v28  ;;  %v854_v32 = vunpack.i.l.bf16 %v853_v28 }
 0x1f4   :  { %v792_v30 = vpack.c.bf16 %v850_v26, %v849_v27  ;;  %v802_v35 = vpack.c.bf16 %v855_v31, %v854_v32 }
 0x1f6   :  { %794 = vmatprep.subr.msk.bf16.mxu0 %vm1083_vm4, %v792_v30 }
 0x1f7   :  { %797 = vmatpush3.bf16.msk.msra.mxu0 %vm1083_vm4, %v792_v30 }
 0x1f8   :  { %799 = vmatprep.subr.bf16.mxu0 %v798_v33 }
 0x1fb   :  { %801 = vmatpush3.bf16.msra.mxu0 %v798_v33 }
 0x1fc   :  { %804 = vmatprep.subr.msk.bf16.mxu0 %vm1093_vm6, %v802_v35 }
 0x1ff   :  { %807 = vmatpush3.bf16.msk.msra.mxu0 %vm1093_vm6, %v802_v35 }
 0x202   :  { %766 = vmatmul.mubr.msk.f32.vlgmr.msra.gmra.mrb[0].mxu0 %vm109_vm2, %v71_v36 }
 0x203   :  { %768 = vmatprep.mubr.msk.f32.mxu0 %vm109_vm2, %v72_v37 }
 0x206   :  { %769 = vmatmul.mubr.msk.f32.gmra.mrb[2].mxu0 %vm109_vm2, %v73_v38 }
 0x2d5   :  { %v767_v40 = vpop.f32.mrb[0].mxu0 }
 0x2d6   :  { %v188_v41 = vpop.f32.mrb[1].mxu0  ;;  %v211_v47 = vsel %vm207_vm7, %v767_v40, 0.0 }
 0x2d7   :  { %v208_v46 = vsel %vm207_vm7, %v188_v41, 0.0 }
 0x2d9   :  { %v770_v42 = vpop.f32.mrb[2].mxu0 }
 0x2da   :  { %v198_v43 = vpop.f32.mrb[3].mxu0  ;;  %v217_v44 = vsel %vm207_vm7, %v770_v42, 0.0 }
 0x2db   :  { %218 = vadd.xlane.f32.xlu1 %v217_v44  ;;  %v214_v45 = vsel %vm207_vm7, %v198_v43, 0.0 }
 0x2dc   :  { %215 = vadd.xlane.f32.xlu0 %v214_v45 }
 0x2e0   :  { %209 = vadd.xlane.f32.xlu0 %v208_v46 }
 0x2e4   :  { %212 = vadd.xlane.f32.xlu0 %v211_v47 }
 0x2ec   :  { %277 = vperm.xlu1 %856, %v263_v48  }
 0x2f0   :  { %858 = vset.pattern.permute.xlu1 %v996_v49 }
 0x368   :  { %v219_v53 = vpop.xlane.xlu1 %218 }
 0x369   :  { %v216_v50 = vpop.xlane.xlu0 %215  ;;  %v224_v56 = vmul.f32 0.015625, %v219_v53 }
 0x36a   :  { %v223_v51 = vmul.f32 0.015625, %v216_v50 }
 0x36b   :  { %v228_v61 = vsub.f32 %v770_v42, %v224_v56 }
 0x36c   :  { %v227_v52 = vsub.f32 %v198_v43, %v223_v51  ;;  %v278_v12 = vpop.permute.xlu1 %277 }
 0x36d   :  { %v210_v54 = vpop.xlane.xlu0 %209  ;;  %v232_v2 = vmul.f32 %v228_v61, %v228_v61 }
 0x36e   :  { %v221_v55 = vmul.f32 0.015625, %v210_v54  ;;  %v231_v8 = vmul.f32 %v227_v52, %v227_v52 }
 0x36f   :  { %v242_v3 = vsel %vm207_vm7, %v232_v2, 0.0 }
 0x370   :  { %v1112_v57 = vsub.f32 %v188_v41, %v221_v55  ;;  %v239_v9 = vsel %vm207_vm7, %v231_v8, 0.0 }
 0x371   :  { %v213_v58 = vpop.xlane.xlu0 %212 }
 0x372   :  { %v222_v59 = vmul.f32 0.015625, %v213_v58  ;;  %v229_v60 = vmul.f32 %v1112_v57, %v1112_v57 }
 0x374   :  { %v1116_v62 = vsub.f32 %v767_v40, %v222_v59  ;;  %v233_v63 = vsel %vm207_vm7, %v229_v60, 0.0 }
 0x375   :  { %234 = vadd.xlane.f32.xlu1 %v233_v63 }
 0x376   :  { %v230_v0 = vmul.f32 %v1116_v62, %v1116_v62 }
 0x378   :  { %v236_v1 = vsel %vm207_vm7, %v230_v0, 0.0 }
 0x379   :  { %237 = vadd.xlane.f32.xlu0 %v236_v1 }
 0x37d   :  { %243 = vadd.xlane.f32.xlu0 %v242_v3 }
 0x386   :  { %298 = vperm.xlu1 %858, %v263_v48  }
 0x38a   :  { %302 = vperm.xlu1 %858, %v264_v4  }
 0x38e   :  { %859 = vset.pattern.permute.xlu1 %v995_v39 }
 0x38f   :  { %267 = vperm.xlu1 %859, %v261_v5  }
 0x393   :  { %282 = vperm.xlu0 %857, %v264_v4  }
 0x3b3   :  { %240 = vadd.xlane.f32.xlu1 %v239_v9 }
 0x3c4   :  { %272 = vperm.xlu1 %859, %v262_v10  }
 0x3c8   :  { %860 = vset.pattern.permute.xlu1 %v996_v49 }
 0x3c9   :  { %290 = vperm.xlu1 %860, %v261_v5  }
 0x3cd   :  { %294 = vperm.xlu1 %860, %v262_v10  }
 0x3d1   :  { %881 = vset.pattern.permute.xlu1 %v995_v39 }
 0x402   :  { %v235_v14 = vpop.xlane.xlu1 %234 }
 0x403   :  { %v245_v26 = vmul.f32 0.015625, %v235_v14  ;;  %v552_v14 = vld [vmem:[%s1292_s4] sm:$0xff] }
 0x405   :  { %v249_v30 = vadd.f32 1e-05, %v245_v26  ;;  %v330_v26 = vld [vmem:[%s1291_s3 + $0x28] sm:$0xff] }
 0x406   :  { %v238_v11 = vpop.xlane.xlu0 %237  ;;  %v299_v16 = vpop.permute.xlu1 %298 }
 0x407   :  { %v246_v28 = vmul.f32 0.015625, %v238_v11 }
 0x409   :  { %v250_v32 = vadd.f32 1e-05, %v246_v28 }
 0x40a   :  { %v244_v13 = vpop.xlane.xlu0 %243  ;;  %v303_v18 = vpop.permute.xlu1 %302 }
 0x40b   :  { %v248_v15 = vmul.f32 0.015625, %v244_v13  ;;  %v325_v13 = vld [vmem:[%s1291_s3] sm:$0xff] }
 0x40c   :  { %783 = vmatprep.mubr.msk.f32.mxu1 %vm109_vm2, %v325_v13 }
 0x40d   :  { %v252_v17 = vadd.f32 1e-05, %v248_v15 }
 0x40e   :  { %v268_v19 = vpop.permute.xlu1 %267 }
 0x40f   :  { %884 = vrsqrt.f32 %v252_v17 }
 0x412   :  { %v283_v24 = vpop.permute.xlu0 %282 }
 0x419   :  { %v885_v20 = vpop.eup %884 }
 0x41a   :  { %v260_v22 = vmul.f32 %v885_v20, %v228_v61 }
 0x41c   :  { %v288_v27 = vmul.f32 %v283_v24, %v260_v22  ;;  %v326_v24 = vld [vmem:[%s1291_s3 + $0x8] sm:$0xff] }
 0x41e   :  { %v308_v31 = vadd.f32 %v303_v18, %v288_v27 }
 0x420   :  { %v714_v33 = vmul.f32 -1.442695, %v308_v31 }
 0x440   :  { %v241_v21 = vpop.xlane.xlu1 %240 }
 0x441   :  { %v247_v23 = vmul.f32 0.015625, %v241_v21 }
 0x443   :  { %v251_v25 = vadd.f32 1e-05, %v247_v23 }
 0x444   :  { %v273_v37 = vpop.permute.xlu1 %272 }
 0x445   :  { %886 = vrsqrt.f32 %v251_v25  ;;  %v327_v25 = vld [vmem:[%s1291_s3 + $0x10] sm:$0xff] }
 0x446   :  { %888 = vrsqrt.f32 %v249_v30 }
 0x447   :  { %890 = vrsqrt.f32 %v250_v32 }
 0x448   :  { %892 = vpow2.f32 %v714_v33  ;;  %v291_v41 = vpop.permute.xlu1 %290 }
 0x44c   :  { %v295_v47 = vpop.permute.xlu1 %294 }
 0x44f   :  { %v887_v35 = vpop.eup %886 }
 0x450   :  { %v259_v36 = vmul.f32 %v887_v35, %v227_v52  ;;  %v889_v42 = vpop.eup %888 }
 0x451   :  { %v891_v43 = vpop.eup %890  ;;  %v257_v44 = vmul.f32 %v889_v42, %v1112_v57  ;;  %v553_v42 = vld [vmem:[%s1292_s4 + $0x8] sm:$0xff] }
 0x452   :  { %v287_v38 = vmul.f32 %v278_v12, %v259_v36  ;;  %v893_v45 = vpop.eup %892  ;;  %v258_v46 = vmul.f32 %v891_v43, %v1116_v62  ;;  %v556_v43 = vld [vmem:[%s1292_s4 + $0x20] sm:$0xff] }
 0x453   :  { %v285_v50 = vmul.f32 %v268_v19, %v257_v44  ;;  %v318_v51 = vadd.f32 1.0, %v893_v45  ;;  %v557_v45 = vld [vmem:[%s1292_s4 + $0x28] sm:$0xff] }
 0x454   :  { %v307_v39 = vadd.f32 %v299_v16, %v287_v38  ;;  %v286_v48 = vmul.f32 %v273_v37, %v258_v46 }
 0x455   :  { %v305_v52 = vadd.f32 %v291_v41, %v285_v50  ;;  %v555_v41 = vld [vmem:[%s1292_s4 + $0x18] sm:$0xff] }
 0x456   :  { %v713_v40 = vmul.f32 -1.442695, %v307_v39  ;;  %v306_v53 = vadd.f32 %v295_v47, %v286_v48 }
 0x458   :  { %894 = vpow2.f32 %v713_v40  ;;  %v554_v40 = vld [vmem:[%s1292_s4 + $0x10] sm:$0xff]  ;;  %s997_s4 = smov 96  }
 0x459   :  { %896 = vrcp.f32 %v318_v51 }
 0x45a   :  { %898 = vtanh.f32 %v306_v53 }
 0x45b   :  { %900 = vtanh.f32 %v305_v52 }
 0x462   :  { %v895_v54 = vpop.eup %894 }
 0x463   :  { %v317_v55 = vadd.f32 1.0, %v895_v54  ;;  %v897_v56 = vpop.eup %896 }
 0x464   :  { %v899_v58 = vpop.eup %898 }
 0x465   :  { %902 = vrcp.f32 %v317_v55  ;;  %v901_v59 = vpop.eup %900  ;;  %v324_v61 = vmul.f32 %v899_v58, %v897_v56 }
 0x46f   :  { %v903_v60 = vpop.eup %902 }
 0x470   :  { %v323_v57 = vmul.f32 %v903_v60, %v901_v59 }
 0x472   :  { %v861_v63 = vpack.i.bf16 %v324_v61, %v323_v57  ;;  %v814_v22 = vpack.c.bf16 %v324_v61, %v323_v57 }
 0x474   :  { %862 = vrot.lane.b32.xlu1 %v861_v63, %s992_s19 }
 0x4e6   :  { %v863_v62 = vpop.permute.xlu1 %862 }
 0x4e7   :  { %v865_v0 = vunpack.i.h.bf16 %v863_v62  ;;  %v864_v1 = vunpack.i.l.bf16 %v863_v62 }
 0x4e9   :  { %v333_v2 = vsel %vm74_vm1, %v864_v1, %v323_v57  ;;  %v336_v3 = vsel %vm74_vm1, %v865_v0, %v324_v61 }
 0x4ea   :  { %v866_v4 = vpack.i.bf16 %v336_v3, %v333_v2 }
 0x4ec   :  { %867 = vrot.lane.b32.xlu1 %v866_v4, %s992_s19 }
 0x55e   :  { %v868_v5 = vpop.permute.xlu1 %867 }
 0x55f   :  { %v870_v8 = vunpack.i.h.bf16 %v868_v5  ;;  %v869_v9 = vunpack.i.l.bf16 %v868_v5 }
 0x561   :  { %v341_v10 = vsel %vm74_vm1, %v869_v9, %v323_v57  ;;  %v342_v11 = vsel %vm74_vm1, %v870_v8, %v324_v61 }
 0x562   :  { %v876_v12 = vpack.i.bf16 %v342_v11, %v341_v10 }
 0x564   :  { %877 = vrot.lane.b32.xlu1 %v876_v12, %s993_s0  ;;  %872 = vrot.lane.b32.xlu0 %v876_v12, %s994_s20 }
 0x568   :  { %560 = vperm.xlu1 %881, %v552_v14  }
 0x5d6   :  { %v873_v15 = vpop.permute.xlu0 %872  ;;  %v878_v18 = vpop.permute.xlu1 %877 }
 0x5d7   :  { %v875_v16 = vunpack.i.h.bf16 %v873_v15  ;;  %v874_v17 = vunpack.i.l.bf16 %v873_v15  ;;  %v880_v20 = vunpack.i.h.bf16 %v878_v18  ;;  %v879_v21 = vunpack.i.l.bf16 %v878_v18 }
 0x5d9   :  { %v808_v19 = vpack.c.bf16 %v875_v16, %v874_v17  ;;  %v818_v23 = vpack.c.bf16 %v880_v20, %v879_v21 }
 0x5db   :  { %810 = vmatprep.subr.msk.bf16.mxu1 %vm1083_vm4, %v808_v19 }
 0x5dc   :  { %813 = vmatpush3.bf16.msk.msra.mxu1 %vm1083_vm4, %v808_v19 }
 0x5dd   :  { %815 = vmatprep.subr.bf16.mxu1 %v814_v22 }
 0x5e0   :  { %817 = vmatpush3.bf16.msra.mxu1 %v814_v22 }
 0x5e1   :  { %820 = vmatprep.subr.msk.bf16.mxu1 %vm1093_vm6, %v818_v23 }
 0x5e4   :  { %823 = vmatpush3.bf16.msk.msra.mxu1 %vm1093_vm6, %v818_v23 }
 0x5e7   :  { %784 = vmatmul.mubr.msk.f32.vlgmr.msra.gmra.mrb[0].mxu1 %vm109_vm2, %v326_v24  ;;  %v1202_v46 = vpop.permute.xlu1 %560 }
 0x5e8   :  { %786 = vmatprep.mubr.msk.f32.mxu1 %vm109_vm2, %v327_v25 }
 0x5eb   :  { %787 = vmatmul.mubr.msk.f32.gmra.mrb[2].mxu1 %vm109_vm2, %v328_v29 }
 0x5ec   :  { %789 = vmatprep.mubr.msk.f32.mxu1 %vm109_vm2, %v329_v34 }
 0x5ef   :  { %790 = vmatmul.mubr.msk.f32.gmra.mrb[4].mxu1 %vm109_vm2, %v330_v26 }
 0x6ba   :  { %v785_v27 = vpop.f32.mrb[0].mxu1 }
 0x6bb   :  { %v445_v28 = vpop.f32.mrb[1].mxu1  ;;  %v477_v30 = vsel %vm207_vm7, %v785_v27, 0.0 }
 0x6bc   :  { %478 = vadd.xlane.f32.xlu1 %v477_v30  ;;  %v474_v31 = vsel %vm207_vm7, %v445_v28, 0.0 }
 0x6bd   :  { %475 = vadd.xlane.f32.xlu0 %v474_v31 }
 0x6be   :  { %v788_v32 = vpop.f32.mrb[2].mxu1 }
 0x6bf   :  { %v483_v33 = vsel %vm207_vm7, %v788_v32, 0.0  ;;  %v455_v35 = vpop.f32.mrb[3].mxu1 }
 0x6c0   :  { %v480_v36 = vsel %vm207_vm7, %v455_v35, 0.0 }
 0x6c1   :  { %484 = vadd.xlane.f32.xlu0 %v483_v33 }
 0x6c2   :  { %v791_v37 = vpop.f32.mrb[4].mxu1 }
 0x6c3   :  { %v465_v38 = vpop.f32.mrb[5].mxu1  ;;  %v489_v39 = vsel %vm207_vm7, %v791_v37, 0.0 }
 0x6c4   :  { %v486_v44 = vsel %vm207_vm7, %v465_v38, 0.0 }
 0x6c5   :  { %481 = vadd.xlane.f32.xlu0 %v480_v36 }
 0x6c9   :  { %490 = vadd.xlane.f32.xlu0 %v489_v39 }
 0x6cd   :  { %570 = vperm.xlu1 %881, %v554_v40  }
 0x6d1   :  { %575 = vperm.xlu1 %881, %v555_v41  }
 0x6df   :  { %565 = vperm.xlu0 %857, %v553_v42  }
 0x6e3   :  { %580 = vperm.xlu0 %857, %v556_v43  }
 0x6e7   :  { %882 = vset.pattern.permute.xlu0 %v996_v49 }
 0x6e8   :  { %595 = vperm.xlu0 %882, %v552_v14  }
 0x6ec   :  { %607 = vperm.xlu0 %882, %v555_v41  }
 0x6f5   :  { %487 = vadd.xlane.f32.xlu1 %v486_v44 }
 0x706   :  { %585 = vperm.xlu1 %881, %v557_v45  }
 0x70a   :  { %883 = vset.pattern.permute.xlu1 %v996_v49 }
 0x70b   :  { %599 = vperm.xlu1 %883, %v553_v42  }
 0x70f   :  { %603 = vperm.xlu1 %883, %v554_v40  }
 0x749   :  { %v479_v47 = vpop.xlane.xlu1 %478 }
 0x74a   :  { %v493_v48 = vmul.f32 0.015625, %v479_v47  ;;  %v476_v50 = vpop.xlane.xlu0 %475 }
 0x74b   :  { %v492_v51 = vmul.f32 0.015625, %v476_v50 }
 0x74c   :  { %v1204_v53 = vsub.f32 %v785_v27, %v493_v48  ;;  %v625_v48 = vmul.f32 0.70710677, %v1066_v7 }
 0x74d   :  { %v1206_v52 = vsub.f32 %v445_v28, %v492_v51  ;;  %v571_v10 = vpop.permute.xlu1 %570  ;;  %v624_v51 = vmul.f32 0.70710677, %v1063_v6 }
 0x74e   :  { %v485_v54 = vpop.xlane.xlu0 %484  ;;  %v505_v55 = vmul.f32 %v1204_v53, %v1204_v53 }
 0x74f   :  { %v495_v56 = vmul.f32 0.015625, %v485_v54  ;;  %v504_v49 = vmul.f32 %v1206_v52, %v1206_v52 }
 0x750   :  { %v513_v58 = vsel %vm207_vm7, %v505_v55, 0.0 }
 0x751   :  { %v1213_v59 = vsub.f32 %v788_v32, %v495_v56  ;;  %514 = vadd.xlane.f32.xlu0 %v513_v58  ;;  %v510_v60 = vsel %vm207_vm7, %v504_v49, 0.0  ;;  %v576_v11 = vpop.permute.xlu1 %575 }
 0x752   :  { %v482_v57 = vpop.xlane.xlu0 %481  ;;  %511 = vadd.xlane.f32.xlu1 %v510_v60 }
 0x753   :  { %v494_v61 = vmul.f32 0.015625, %v482_v57  ;;  %v507_v63 = vmul.f32 %v1213_v59, %v1213_v59 }
 0x755   :  { %v1218_v62 = vsub.f32 %v455_v35, %v494_v61  ;;  %v519_v0 = vsel %vm207_vm7, %v507_v63, 0.0 }
 0x756   :  { %520 = vadd.xlane.f32.xlu0 %v519_v0  ;;  %v491_v1 = vpop.xlane.xlu0 %490 }
 0x757   :  { %v497_v2 = vmul.f32 0.015625, %v491_v1  ;;  %v506_v3 = vmul.f32 %v1218_v62, %v1218_v62 }
 0x759   :  { %v1223_v4 = vsub.f32 %v791_v37, %v497_v2  ;;  %v516_v5 = vsel %vm207_vm7, %v506_v3, 0.0 }
 0x75a   :  { %517 = vadd.xlane.f32.xlu1 %v516_v5 }
 0x75b   :  { %v509_v8 = vmul.f32 %v1223_v4, %v1223_v4 }
 0x75d   :  { %v525_v9 = vsel %vm207_vm7, %v509_v8, 0.0 }
 0x75e   :  { %526 = vadd.xlane.f32.xlu0 %v525_v9  ;;  %v566_v17 = vpop.permute.xlu0 %565 }
 0x762   :  { %v1234_v18 = vpop.permute.xlu0 %580 }
 0x767   :  { %v596_v20 = vpop.permute.xlu0 %595 }
 0x76b   :  { %v608_v22 = vpop.permute.xlu0 %607 }
 0x774   :  { %615 = vperm.xlu0 %882, %v557_v45  }
 0x782   :  { %v488_v12 = vpop.xlane.xlu1 %487 }
 0x783   :  { %v496_v13 = vmul.f32 0.015625, %v488_v12 }
 0x785   :  { %v1229_v14 = vsub.f32 %v465_v38, %v496_v13 }
 0x786   :  { %v586_v19 = vpop.permute.xlu1 %585 }
 0x787   :  { %v508_v15 = vmul.f32 %v1229_v14, %v1229_v14 }
 0x789   :  { %v522_v16 = vsel %vm207_vm7, %v508_v15, 0.0 }
 0x78a   :  { %523 = vadd.xlane.f32.xlu1 %v522_v16  ;;  %v600_v21 = vpop.permute.xlu1 %599 }
 0x78e   :  { %v604_v23 = vpop.permute.xlu1 %603 }
 0x79b   :  { %611 = vperm.xlu1 %883, %v556_v43  }
 0x7de   :  { %v515_v24 = vpop.xlane.xlu0 %514 }
 0x7df   :  { %v529_v25 = vmul.f32 0.015625, %v515_v24  ;;  %v512_v29 = vpop.xlane.xlu1 %511 }
 0x7e0   :  { %v528_v34 = vmul.f32 0.015625, %v512_v29 }
 0x7e1   :  { %v535_v26 = vadd.f32 1e-05, %v529_v25 }
 0x7e2   :  { %v534_v27 = vadd.f32 1e-05, %v528_v34 }
 0x7e3   :  { %904 = vrsqrt.f32 %v535_v26  ;;  %v521_v28 = vpop.xlane.xlu0 %520 }
 0x7e4   :  { %906 = vrsqrt.f32 %v534_v27  ;;  %v531_v30 = vmul.f32 0.015625, %v521_v28 }
 0x7e6   :  { %v537_v31 = vadd.f32 1e-05, %v531_v30 }
 0x7e7   :  { %v518_v32 = vpop.xlane.xlu1 %517 }
 0x7e8   :  { %908 = vrsqrt.f32 %v537_v31  ;;  %v530_v33 = vmul.f32 0.015625, %v518_v32 }
 0x7ea   :  { %v536_v35 = vadd.f32 1e-05, %v530_v33 }
 0x7eb   :  { %v527_v36 = vpop.xlane.xlu0 %526 }
 0x7ec   :  { %910 = vrsqrt.f32 %v536_v35  ;;  %v533_v37 = vmul.f32 0.015625, %v527_v36 }
 0x7ed   :  { %v905_v38 = vpop.eup %904 }
 0x7ee   :  { %v907_v39 = vpop.eup %906  ;;  %v539_v40 = vadd.f32 1e-05, %v533_v37  ;;  %v547_v41 = vmul.f32 %v905_v38, %v1204_v53 }
 0x7ef   :  { %v546_v42 = vmul.f32 %v907_v39, %v1206_v52 }
 0x7f0   :  { %912 = vrsqrt.f32 %v539_v40  ;;  %v589_v43 = vmul.f32 %v566_v17, %v547_v41 }
 0x7f1   :  { %v588_v44 = vmul.f32 %v1202_v46, %v546_v42 }
 0x7f2   :  { %v909_v45 = vpop.eup %908  ;;  %v619_v47 = vadd.f32 %v600_v21, %v589_v43 }
 0x7f3   :  { %v618_v50 = vadd.f32 %v596_v20, %v588_v44  ;;  %v549_v54 = vmul.f32 %v909_v45, %v1213_v59  ;;  %v616_v57 = vpop.permute.xlu0 %615 }
 0x7f4   :  { %v627_v55 = vadd.f32 %v625_v48, %v619_v47 }
 0x7f5   :  { %v626_v56 = vadd.f32 %v624_v51, %v618_v50  ;;  %v591_v49 = vmul.f32 %v576_v11, %v549_v54 }
 0x7f6   :  { %v911_v58 = vpop.eup %910  ;;  %638 = vrot.lane.b32.xlu0 %v627_v55, %s997_s4  ;;  %629 = vst.msk [vmem:[#allocation5 + $0x8] sm:$0xff] %vm51_vm0, %v627_v55 }
 0x7f7   :  { %636 = vrot.lane.b32.xlu1 %v626_v56, %s997_s4  ;;  %628 = vst.msk [vmem:[#allocation5] sm:$0xff] %vm51_vm0, %v626_v56  ;;  %v621_v46 = vadd.f32 %v608_v22, %v591_v49  ;;  %v548_v53 = vmul.f32 %v911_v58, %v1218_v62 }
 0x7f9   :  { %631 = vst.msk [vmem:[#allocation6 + $0x8] sm:$0xff] %vm51_vm0, %v621_v46  ;;  %v590_v7 = vmul.f32 %v571_v10, %v548_v53 }
 0x7fa   :  { %v913_v6 = vpop.eup %912  ;;  %651 = vrot.lane.b32.xlu0 %v621_v46, %s997_s4 }
 0x7fb   :  { %v551_v52 = vmul.f32 %v913_v6, %v1223_v4  ;;  %v620_v59 = vadd.f32 %v604_v23, %v590_v7 }
 0x7fd   :  { %v593_v60 = vmul.f32 %v586_v19, %v551_v52  ;;  %649 = vrot.lane.b32.xlu1 %v620_v59, %s997_s4  ;;  %630 = vst.msk [vmem:[#allocation6] sm:$0xff] %vm51_vm0, %v620_v59 }
 0x7ff   :  { %v623_v61 = vadd.f32 %v616_v57, %v593_v60 }
 0x801   :  { %633 = vst.msk [vmem:[#allocation6 + $0x18] sm:$0xff] %vm51_vm0, %v623_v61  ;;  %655 = vrot.lane.b32.xlu0 %v623_v61, %s997_s4 }
 0x817   :  { %v524_v63 = vpop.xlane.xlu1 %523 }
 0x818   :  { %v532_v0 = vmul.f32 0.015625, %v524_v63 }
 0x81a   :  { %v538_v62 = vadd.f32 1e-05, %v532_v0 }
 0x81b   :  { %v612_v4 = vpop.permute.xlu1 %611 }
 0x81c   :  { %914 = vrsqrt.f32 %v538_v62 }
 0x826   :  { %v915_v1 = vpop.eup %914 }
 0x827   :  { %v550_v2 = vmul.f32 %v915_v1, %v1229_v14 }
 0x829   :  { %v592_v3 = vmul.f32 %v1234_v18, %v550_v2 }
 0x82b   :  { %v622_v5 = vadd.f32 %v612_v4, %v592_v3 }
 0x82d   :  { %632 = vst.msk [vmem:[#allocation6 + $0x10] sm:$0xff] %vm51_vm0, %v622_v5  ;;  %653 = vrot.lane.b32.xlu1 %v622_v5, %s997_s4 }
 0x868   :  { %v639_v8 = vpop.permute.xlu0 %638 }
 0x869   :  { %644 = vst.msk [vmem:[#allocation5 + $0x18] sm:$0xff] %vm51_vm0, %v639_v8  ;;  %v637_v9 = vpop.permute.xlu1 %636 }
 0x86a   :  { %643 = vst.msk [vmem:[#allocation5 + $0x10] sm:$0xff] %vm51_vm0, %v637_v9 }
 0x86b   :  { %949 = shalt.err (!%p946_p12)
}
 0x86c   :  { %s950_s9 = scalar_lea.hbm %s1293_s5, 512 }
 0x86d   :  { %p951_p13 = scmp.ne.s32.totalorder %s1293_s5, %s950_s9  ;;  %p954_p0 = scmp.lt.u32.totalorder %s950_s9, %s1293_s5 }
 0x86f   :  { %p956_p1 = pnand %p954_p0, %p951_p13 }
 0x871   :  { %959 = shalt.err (!%p956_p1)
}
 0x872   :  { %677 = dma.vmem_to_hbm [thread:$0]  %s672_s28, 512, %s1293_s5, [#allocation4], %s989_s7, %s989_s7, %s990_s8   ;;  %v652_v10 = vpop.permute.xlu0 %651  ;;  %v650_v11 = vpop.permute.xlu1 %649 }
 0x873   :  { %663 = vst.msk [vmem:[#allocation6 + $0x28] sm:$0xff] %vm51_vm0, %v652_v10  ;;  %662 = vst.msk [vmem:[#allocation6 + $0x20] sm:$0xff] %vm51_vm0, %v650_v11  ;;  %s999_s16 = smov [#allocation6]  }
 0x874   :  { %s683_s17 = sshll.u32 %s999_s16, 4  ;;  %s684_s17 = int_to_ptr.vmem [resolvable:$true] %s683_s17 }
 0x875   :  { %s960_s1 = scalar_lea.vmem %s684_s17, 1024  ;;  %p965_p3 = scmp.lt.s32.totalorder %s684_s17, %s684_s17 }
 0x876   :  { %v656_v12 = vpop.permute.xlu0 %655  ;;  %p961_p2 = scmp.ne.s32.totalorder %s684_s17, %s960_s1  ;;  %p966_p4 = scmp.lt.s32.totalorder %s960_s1, %s960_s1 }
 0x877   :  { %665 = vst.msk [vmem:[#allocation6 + $0x38] sm:$0xff] %vm51_vm0, %v656_v12 }
 0x878   :  { %p967_p5 = por %p966_p4, %p965_p3 }
 0x87a   :  { %p968_p6 = pnand %p967_p5, %p961_p2 }
 0x89f   :  { %v654_v13 = vpop.permute.xlu1 %653 }
 0x8a0   :  { %664 = vst.msk [vmem:[#allocation6 + $0x30] sm:$0xff] %vm51_vm0, %v654_v13 }
 0x8a1   :  { %971 = shalt.err (!%p968_p6)
}
 0x8a2   :  { %s972_s3 = scalar_lea.hbm %s1294_s6, 1024 }
 0x8a3   :  { %p973_p7 = scmp.ne.s32.totalorder %s1294_s6, %s972_s3  ;;  %p976_p8 = scmp.lt.u32.totalorder %s972_s3, %s1294_s6 }
 0x8a5   :  { %p978_p9 = pnand %p976_p8, %p973_p7 }
 0x8a7   :  { %981 = shalt.err (!%p978_p9)
}
 0x8a8   :  { %689 = dma.vmem_to_hbm [thread:$0]  %s684_s17, 1024, %s1294_s6, [#allocation7], %s989_s7, %s989_s7, %s990_s8  }
 0x8a9   :  { %984 = dma.done.wait [#allocation4], 512  }
 0x8aa   :  { %985 = vsyncadd [#allocation4], 4294966784 }
 0x8ab   :  { %986 = dma.done.wait [#allocation7], 1024  }
 0x8ac   :  { %987 = vsyncadd [#allocation7], 4294966272 }
 0x8ad   :  { %696 = vsyncpa [#allocation3], 1 }
 0x8ae   :  { %697 = vsyncpa [#allocation4], 1 }
 0x8af   :  { %698 = vsyncpa [#allocation7], 1 }

</bundles_post_ra>
